<compile_context>
chip_gen: v6e
topology: v6e:2x2x1
jax: 0.10.0
libtpu: 0.0.40
codegen_flags: <defaults>
</compile_context>

<pallas_src>
import jax
import jax.numpy as jnp
from jax import lax
from jax.experimental import pallas as pl
from jax.experimental.pallas import tpu as pltpu


def _round_up(x, m):
    return (x + m - 1) // m * m


# ------------------------- fused encoder matmul (MXU) -------------------------

def _fused_linear_kernel(x_ref, w_ref, b_ref, o_ref):
    # o = x @ [W_b2e | W_e2b] + [b_b2e | b_e2b]   (single MXU matmul, f32 acc)
    o_ref[...] = (
        jnp.dot(x_ref[...], w_ref[...], preferred_element_type=jnp.float32)
        + b_ref[...]
    ).astype(o_ref.dtype)


def fused_linear_encoder(x_flat, w, b, *, tile_m=512):
    """x_flat (N, Din) @ w (Din, W) + b -> (N, W).

    Big row tiles (default 512) keep this mem-bound matmul near the HBM
    roofline; the grid uses cdiv so there is no host-side jnp.pad pass over x
    (the partial last block's stores are masked by the pipeline).  Tiles stay
    far under even v7x's 32 MiB scoped-VMEM default.
    """
    N, Din = x_flat.shape
    W = w.shape[1]
    tile_m = min(tile_m, _round_up(N, 8))        # clamp for tiny N
    return pl.pallas_call(
        _fused_linear_kernel,
        out_shape=jax.ShapeDtypeStruct((N, W), x_flat.dtype),
        grid_spec=pltpu.PrefetchScalarGridSpec(
            num_scalar_prefetch=0,
            grid=(pl.cdiv(N, tile_m),),
            in_specs=[
                pl.BlockSpec((tile_m, Din), lambda i: (i, 0)),
                pl.BlockSpec((Din, W), lambda i: (0, 0)),     # weights resident
                pl.BlockSpec((1, W), lambda i: (0, 0)),       # bias resident
            ],
            out_specs=pl.BlockSpec((tile_m, W), lambda i: (i, 0)),
        ),
        compiler_params=pltpu.CompilerParams(dimension_semantics=("parallel",)),
    )(x_flat, w, b.reshape(1, W))


# ---------------------- batched DMA row-gather (left+right) ----------------------

_UNROLL = 8   # rows per issue-loop iteration (manual unroll for LLO overlap)


def _gather_pair_kernel(li_ref, ri_ref, src_ref, left_ref, right_ref, sem):
    # Per grid step: gather G left rows (b2e half of the fused row) and G right
    # rows (e2b half) with half-row DMAs issued DIRECTLY from HBM into the
    # output VMEM blocks, then retire each stream with a single bulk wait.
    g = pl.program_id(0)
    G, dout = left_ref.shape

    def _issue(k, carry):
        # _UNROLL rows per iteration: SMEM id loads, address math and the
        # misc-slot descriptor pushes overlap across rows.
        for u in range(_UNROLL):
            row = k * _UNROLL + u
            li = li_ref[g * G + row]
            ri = ri_ref[g * G + row]
            pltpu.make_async_copy(
                src_ref.at[pl.ds(li, 1), pl.ds(0, dout)],        # b2e half
                left_ref.at[pl.ds(row, 1), :], sem.at[0]).start()
            pltpu.make_async_copy(
                src_ref.at[pl.ds(ri, 1), pl.ds(dout, dout)],     # e2b half
                right_ref.at[pl.ds(row, 1), :], sem.at[1]).start()
        return carry

    lax.fori_loop(0, G // _UNROLL, _issue, 0)

    # Bulk drain: DMA semaphores count bytes, and every copy on a given
    # semaphore here has identical (1, dout) size, so one wait sized to the
    # whole (G, dout) output block retires all G row copies of that stream.
    # (The descriptor refs are only used for their byte count; they are never
    # started.  Using the output block keeps the dummy descriptor in-bounds
    # even when G exceeds the number of source rows.)
    pltpu.make_async_copy(left_ref, left_ref, sem.at[0]).wait()
    pltpu.make_async_copy(right_ref, right_ref, sem.at[1]).wait()


def gather_pair(src, left_ids, right_ids, dout, *, rows_per_step=256):
    """index_select of left/right context rows from the fused (rows, 2*dout)
    encoder output; G rows per grid step, ids scalar-prefetched into SMEM."""
    n_rows, W = src.shape
    assert W >= 2 * dout
    n = int(left_ids.shape[0])
    G = _round_up(min(rows_per_step, _round_up(n, 8)), _UNROLL)
    n_pad = _round_up(n, G)
    if n_pad != n:
        pad = jnp.zeros((n_pad - n,), jnp.int32)      # padded rows gather row 0
        left_ids = jnp.concatenate([left_ids, pad])
        right_ids = jnp.concatenate([right_ids, pad])
    left, right = pl.pallas_call(
        _gather_pair_kernel,
        out_shape=(jax.ShapeDtypeStruct((n_pad, dout), src.dtype),
                   jax.ShapeDtypeStruct((n_pad, dout), src.dtype)),
        grid_spec=pltpu.PrefetchScalarGridSpec(
            num_scalar_prefetch=2,
            grid=(n_pad // G,),
            in_specs=[pl.BlockSpec(memory_space=pl.ANY)],        # HBM src, manual DMA
            out_specs=(pl.BlockSpec((G, dout), lambda g, li, ri: (g, 0)),
                       pl.BlockSpec((G, dout), lambda g, li, ri: (g, 0))),
            scratch_shapes=[pltpu.SemaphoreType.DMA((2,))]),
        compiler_params=pltpu.CompilerParams(dimension_semantics=("parallel",)),
    )(left_ids, right_ids, src)
    return left[:n], right[:n]


# ------------------------------ host-side glue ------------------------------

def flip_by_length(inputs, lengths):
    """Reverse each sequence within its valid length (reference path only)."""
    B, T, _ = inputs.shape
    lens = jnp.asarray(lengths, dtype=jnp.int32)[:, None]
    pos = jnp.arange(T, dtype=jnp.int32)[None, :]
    idx = jnp.where(pos < lens, lens - 1 - pos, pos)
    return inputs[jnp.arange(B)[:, None], idx]


def gen_context_ids_folded(lengths, max_span_len, T, include):
    """Span-context ids into the UNFLIPPED per-timestep encoding.
    The e2b flip is folded into the ids: encoding(flip(x))[t] == encoding(x)[L-1-t],
    so id (L-1-i) on the flipped stream becomes i, and (L-2-j) becomes j+1."""
    b2e_ids, e2b_ids = [], []
    for b, L in enumerate(lengths):
        base = b * T
        for i in range(L):
            for j in range(i, min(i + max_span_len, L)):
                if include:
                    b2e_ids.append(base + j)
                    e2b_ids.append(base + i)                          # flip folded
                else:
                    b2e_ids.append(base + (i - 1) if i > 0 else -1)
                    e2b_ids.append(base + (j + 1) if j < L - 1 else -1)  # flip folded
    return b2e_ids, e2b_ids


class ContextEnumerator:
    """JAX/Pallas port of the PyTorch ContextEnumerator (linear encoders)."""

    def __init__(self, max_span_len, in_size, out_size, include=True, key=None,
                 compute_dtype=jnp.float32):
        self.max_span_len = max_span_len
        self.out_size = out_size
        self.include = include
        self.compute_dtype = compute_dtype   # set to jnp.bfloat16 on v6e/v7x
        k1, k2, k3, k4, k5, k6 = jax.random.split(key, 6)
        scale = 1.0 / jnp.sqrt(jnp.float32(in_size))
        self.w_b2e = jax.random.normal(k1, (in_size, out_size), jnp.float32) * scale
        self.b_b2e = jax.random.normal(k2, (out_size,), jnp.float32) * 0.01
        self.w_e2b = jax.random.normal(k3, (in_size, out_size), jnp.float32) * scale
        self.b_e2b = jax.random.normal(k4, (out_size,), jnp.float32) * 0.01
        # Fused weights: one matmul produces [b2e | e2b] per timestep.
        self.w_fused = jnp.concatenate([self.w_b2e, self.w_e2b], axis=1)
        self.b_fused = jnp.concatenate([self.b_b2e, self.b_e2b], axis=0)
        if not include:
            xav = (2.0 / (1.0 + out_size)) ** 0.5   # xavier_normal_ std for (1, out)
            self.b_start = jax.random.normal(k5, (1, out_size), jnp.float32) * xav
            self.e_start = jax.random.normal(k6, (1, out_size), jnp.float32) * xav

    def __call__(self, inputs, lengths):
        B, T, Din = inputs.shape
        lengths = [int(l) for l in lengths]

        x = inputs.reshape(B * T, Din)
        w, bias = self.w_fused, self.b_fused
        if self.compute_dtype != jnp.float32:
            # Halves encoder HBM traffic and gather DMA bytes; MXU still
            # accumulates in f32 (preferred_element_type).
            x = x.astype(self.compute_dtype)
            w = w.astype(self.compute_dtype)
            bias = bias.astype(self.compute_dtype)

        # One fused encoder pass over the unflipped input (the flip is in the ids).
        enc = fused_linear_encoder(x, w, bias)                 # (B*T, 2*Dout)

        b2e_ids, e2b_ids = gen_context_ids_folded(
            lengths, self.max_span_len, T, self.include)
        if self.include:
            l_ids, r_ids = b2e_ids, e2b_ids
            l_sent = r_sent = None
        else:
            # Sentinel (-1) ids: clamp to row 0 and fix up after the gather with
            # a cheap elementwise select against the tiny start tensors, instead
            # of rewriting the whole encoder output in HBM via concatenate.
            l_sent = jnp.asarray([e == -1 for e in b2e_ids], dtype=bool)
            r_sent = jnp.asarray([e == -1 for e in e2b_ids], dtype=bool)
            l_ids = [0 if e == -1 else e for e in b2e_ids]
            r_ids = [0 if e == -1 else e for e in e2b_ids]

        left, right = gather_pair(enc,
                                  jnp.asarray(l_ids, jnp.int32),
                                  jnp.asarray(r_ids, jnp.int32),
                                  self.out_size)
        if not self.include:
            left = jnp.where(l_sent[:, None], self.b_start.astype(left.dtype), left)
            right = jnp.where(r_sent[:, None], self.e_start.astype(right.dtype), right)
        return left, right


# ------------------------------ reference (pure JAX) ------------------------------

def reference_forward(model, inputs, lengths):
    """Mirrors the original PyTorch forward verbatim (explicit flip, two encoders,
    original unfolded ids, index_select)."""
    B, T, Din = inputs.shape
    b2e = inputs.reshape(B * T, Din) @ model.w_b2e + model.b_b2e
    e2b = flip_by_length(inputs, lengths).reshape(B * T, Din) @ model.w_e2b + model.b_e2b
    b2e_ids, e2b_ids = [], []
    for b, L in enumerate(lengths):
        for i in range(L):
            for j in range(i, min(i + model.max_span_len, L)):
                if model.include:
                    b2e_ids.append(b * T + j)
                    e2b_ids.append(b * T + (L - 1 - i))
                else:
                    b2e_ids.append(b * T + (i - 1) if i > 0 else -1)
                    e2b_ids.append(b * T + (L - 2 - j) if j < L - 1 else -1)
    if not model.include:
        pad_index = b2e.shape[0]
        b2e_ids = [e if e != -1 else pad_index for e in b2e_ids]
        e2b_ids = [e if e != -1 else pad_index for e in e2b_ids]
        b2e = jnp.concatenate([b2e, model.b_start], axis=0)
        e2b = jnp.concatenate([e2b, model.e_start], axis=0)
    left = b2e[jnp.asarray(b2e_ids, jnp.int32)]
    right = e2b[jnp.asarray(e2b_ids, jnp.int32)]
    return left, right


# ----------------------------------- main -----------------------------------

if __name__ == "__main__":
    key = jax.random.PRNGKey(0)
    kx, kp = jax.random.split(key)

    B, T, Din, Dout = 2, 8, 32, 32
    max_span_len = 3
    lengths = [8, 5]

    inputs = jax.random.normal(kx, (B, T, Din), jnp.float32)

    for include in (True, False):
        model = ContextEnumerator(max_span_len, Din, Dout, include=include, key=kp)
        left, right = model(inputs, lengths)
        jax.block_until_ready((left, right))

        left_ref, right_ref = reference_forward(model, inputs, lengths)
        assert left.shape == left_ref.shape and right.shape == right_ref.shape
        assert jnp.allclose(left, left_ref, atol=1e-5, rtol=1e-5), f"left mismatch (include={include})"
        assert jnp.allclose(right, right_ref, atol=1e-5, rtol=1e-5), f"right mismatch (include={include})"

    print("KERNEL_OK")
</pallas_src>

<mosaic_0001>
module attributes {stable_mosaic.version = 11 : i64} {
  func.func @_fused_linear_kernel(%arg0: i32, %arg1: memref<16x32xf32, #tpu.memory_space<vmem>>, %arg2: memref<32x64xf32, #tpu.memory_space<vmem>>, %arg3: memref<1x64xf32, #tpu.memory_space<vmem>>, %arg4: memref<16x64xf32, #tpu.memory_space<vmem>>) attributes {dimension_semantics = [#tpu.dimension_semantics<parallel>], iteration_bounds = array<i64: 1>, scalar_prefetch = 0 : i64, scratch_operands = 0 : i64, tpu.core_type = #tpu.core_type<tc>, window_params = [{transform_indices = @transform_0, window_bounds = array<i64: 16, 32>}, {pipeline_mode = #tpu.pipeline_mode<synchronous>, transform_indices = @transform_1, window_bounds = array<i64: 32, 64>}, {pipeline_mode = #tpu.pipeline_mode<synchronous>, transform_indices = @transform_2, window_bounds = array<i64: 1, 64>}, {transform_indices = @transform_3, window_bounds = array<i64: 16, 64>}]} {
    %c0 = arith.constant 0 : index
    %c0_0 = arith.constant 0 : index
    %0 = vector.load %arg1[%c0, %c0_0] : memref<16x32xf32, #tpu.memory_space<vmem>>, vector<16x32xf32>
    %c0_1 = arith.constant 0 : index
    %c0_2 = arith.constant 0 : index
    %1 = vector.load %arg2[%c0_1, %c0_2] : memref<32x64xf32, #tpu.memory_space<vmem>>, vector<32x64xf32>
    %cst = arith.constant dense<0.000000e+00> : vector<16x64xf32>
    %2 = tpu.matmul %0, %1, %cst {dimension_numbers = #tpu.dot_dimension_numbers<[1], [0], [0], [1], [0, 0, 1, 1], [], []>} : vector<16x32xf32>, vector<32x64xf32>, vector<16x64xf32> -> vector<16x64xf32>
    %c0_3 = arith.constant 0 : index
    %c0_4 = arith.constant 0 : index
    %3 = vector.load %arg3[%c0_3, %c0_4] : memref<1x64xf32, #tpu.memory_space<vmem>>, vector<1x64xf32>
    %4 = vector.broadcast %3 : vector<1x64xf32> to vector<16x64xf32>
    %5 = arith.addf %2, %4 : vector<16x64xf32>
    %c0_5 = arith.constant 0 : index
    %c0_6 = arith.constant 0 : index
    %6 = vector.load %arg4[%c0_5, %c0_6] : memref<16x64xf32, #tpu.memory_space<vmem>>, vector<16x64xf32>
    tpu.vector_store %arg4[%c0_5, %c0_6], %5 {strides = array<i32>} : memref<16x64xf32, #tpu.memory_space<vmem>>, vector<16x64xf32>,
    return
  }
  func.func @transform_0(%arg0: i32) -> (i32, i32) {
    %c0_i32 = arith.constant 0 : i32
    %c0_i32_0 = arith.constant 0 : i32
    return %arg0, %c0_i32 : i32, i32
  }
  func.func @transform_1(%arg0: i32) -> (i32, i32) {
    %c0_i32 = arith.constant 0 : i32
    %c0_i32_0 = arith.constant 0 : i32
    %c0_i32_1 = arith.constant 0 : i32
    return %c0_i32, %c0_i32_0 : i32, i32
  }
  func.func @transform_2(%arg0: i32) -> (i32, i32) {
    %c0_i32 = arith.constant 0 : i32
    %c0_i32_0 = arith.constant 0 : i32
    %c0_i32_1 = arith.constant 0 : i32
    return %c0_i32, %c0_i32_0 : i32, i32
  }
  func.func @transform_3(%arg0: i32) -> (i32, i32) {
    %c0_i32 = arith.constant 0 : i32
    %c0_i32_0 = arith.constant 0 : i32
    return %arg0, %c0_i32 : i32, i32
  }
}

</mosaic_0001>

<bundles_post_ra>
// kernel: tpu_custom_call.1
= control target key start
LH: loop header
LB: loop body
LE: loop exit
PB: predicated region body
PF: predicated region fallthrough
CT: control target
= control target key end

     0   :  { %8 = vsyncpa [#allocation3], 0  ;;  %s298_s0 = inlined_call_operand.hbm [shape: f32[16,32], index: 0, kind: input, shape index: {}]   ;;  %s299_s1 = inlined_call_operand.hbm [shape: f32[32,64], index: 1, kind: input, shape index: {}]   ;;  %s300_s2 = inlined_call_operand.vmem [shape: f32[1,64], index: 2, kind: input, shape index: {}]   ;;  %s301_s3 = inlined_call_operand.hbm [shape: f32[16,64], index: 3, kind: output, shape index: {}]  }
   0x1   :  { %9 = vsyncpa [#allocation6], 0 }
   0x2   :  { %10 = vsyncpa [#allocation4], 0  ;;  %s250_s12 = smov [#allocation2]  }
   0x3   :  { %s16_s13 = sshll.u32 %s250_s12, 4  ;;  %s17_s13 = int_to_ptr.vmem [resolvable:$true] %s16_s13 }
   0x4   :  { %s192_s14 = scalar_lea.vmem %s17_s13, 256  ;;  %p197_p1 = scmp.lt.s32.totalorder %s17_s13, %s17_s13 }
   0x5   :  { %p193_p0 = scmp.ne.s32.totalorder %s17_s13, %s192_s14  ;;  %p198_p2 = scmp.lt.s32.totalorder %s192_s14, %s192_s14 }
   0x7   :  { %p199_p3 = por %p198_p2, %p197_p1 }
   0x9   :  { %p200_p4 = pnand %p199_p3, %p193_p0 }
   0xb   :  { %203 = shalt.err (!%p200_p4)
}
   0xc   :  { %s251_s15 = smov 128   ;;  %s252_s16 = smov 8  }
   0xd   :  { %22 = dma.hbm_to_vmem [thread:$0]  %s298_s0, 256, %s17_s13, [#allocation3], %s251_s15, %s251_s15, %s252_s16  }
   0xe   :  { %s253_s19 = smov [#allocation5]  }
   0xf   :  { %s28_s20 = sshll.u32 %s253_s19, 4  ;;  %s29_s20 = int_to_ptr.vmem [resolvable:$true] %s28_s20 }
  0x10   :  { %s212_s21 = scalar_lea.vmem %s29_s20, 512  ;;  %p217_p6 = scmp.lt.s32.totalorder %s29_s20, %s29_s20 }
  0x11   :  { %p213_p5 = scmp.ne.s32.totalorder %s29_s20, %s212_s21  ;;  %p218_p7 = scmp.lt.s32.totalorder %s212_s21, %s212_s21 }
  0x13   :  { %p219_p8 = por %p218_p7, %p217_p6 }
  0x15   :  { %p220_p9 = pnand %p219_p8, %p213_p5 }
  0x17   :  { %223 = shalt.err (!%p220_p9)
}
  0x18   :  { %34 = dma.hbm_to_vmem [thread:$0]  %s299_s1, 512, %s29_s20, [#allocation6], %s251_s15, %s251_s15, %s252_s16  }
  0x19   :  { %244 = dma.done.wait [#allocation3], 256  }
  0x1a   :  { %245 = vsyncadd [#allocation3], 4294967040 }
  0x1b   :  { %246 = dma.done.wait [#allocation6], 512  }
  0x1c   :  { %247 = vsyncadd [#allocation6], 4294966784  ;;  %vm56_vm0 = vcmask 261120   ;;  %v48_v0 = vld [vmem:[#allocation5 + $0x18] sm:$0xff]  ;;  %v47_v1 = vld [vmem:[#allocation5 + $0x10] sm:$0xff]  ;;  %vm138_vm1 = vcmask 523264  }
  0x1d   :  { %168 = vmatprep.subr.mxu0 %v48_v0  ;;  %v43_v2 = vld [vmem:[#allocation2] sm:$0xff]  ;;  %v46_v3 = vld [vmem:[#allocation5 + $0x8] sm:$0xff]  ;;  %v45_v4 = vld [vmem:[#allocation5] sm:$0xff]  ;;  %s254_s24 = smov [#allocation7]  }
  0x1e   :  { %169 = vmatpush3.msra.mxu0 %v48_v0  ;;  %176 = vmatprep.mubr.msk.f32.mxu0 %vm56_vm0, %v43_v2  ;;  %v44_v5 = vld [vmem:[#allocation2 + $0x8] sm:$0xff]  ;;  %v159_v6 = vld [vmem:[%s300_s2] ss:$0 sm:$0xff]  ;;  %s146_s25 = sshll.u32 %s254_s24, 4  ;;  %s147_s25 = int_to_ptr.vmem [resolvable:$true] %s146_s25 }
  0x1f   :  { %170 = vmatprep.subr.mxu0 %v47_v1  ;;  %s224_s26 = scalar_lea.vmem %s147_s25, 256  ;;  %p229_p11 = scmp.lt.s32.totalorder %s147_s25, %s147_s25 }
  0x20   :  { %171 = vmatpush3.msra.mxu0 %v47_v1  ;;  %p225_p10 = scmp.ne.s32.totalorder %s147_s25, %s224_s26  ;;  %p230_p12 = scmp.lt.s32.totalorder %s224_s26, %s224_s26 }
  0x21   :  { %172 = vmatprep.subr.mxu0 %v46_v3 }
  0x22   :  { %173 = vmatpush3.msra.mxu0 %v46_v3  ;;  %p231_p13 = por %p230_p12, %p229_p11 }
  0x23   :  { %174 = vmatprep.subr.mxu0 %v45_v4 }
  0x24   :  { %175 = vmatpush3.msra.mxu0 %v45_v4  ;;  %p232_p0 = pnand %p231_p13, %p225_p10 }
  0x25   :  { %177 = vmatmul.mubr.msk.f32.vlgmr.msra.gmra.mxu0 %vm56_vm0, %v44_v5 }
  0xe5   :  { %v178_v7 = vpop.f32.mrf.mxu0 }
  0xe6   :  { %v135_v8 = vadd.f32 %v178_v7, %v159_v6 }
  0xe7   :  { %v129_v9 = vpop.f32.mrf.mxu0 }
  0xe8   :  { %v130_v10 = vadd.f32 %v159_v6, %v129_v9  ;;  %140 = vst.msk [vmem:[#allocation7 + $0x8] sm:$0xff] %vm138_vm1, %v135_v8 }
  0xea   :  { %139 = vst.msk [vmem:[#allocation7] sm:$0xff] %vm138_vm1, %v130_v10 }
  0xeb   :  { %235 = shalt.err (!%p232_p0)
}
  0xec   :  { %152 = dma.vmem_to_hbm [thread:$0]  %s147_s25, 256, %s301_s3, [#allocation4], %s251_s15, %s251_s15, %s252_s16  }
  0xed   :  { %248 = dma.done.wait [#allocation4], 256  }
  0xee   :  { %249 = vsyncadd [#allocation4], 4294967040 }
  0xef   :  { %156 = vsyncpa [#allocation3], 1 }
  0xf0   :  { %157 = vsyncpa [#allocation6], 1 }
  0xf1   :  { %158 = vsyncpa [#allocation4], 1 }

</bundles_post_ra>
